<compile_context>
chip_gen: v7x
topology: tpu7x:2x2x1
jax: 0.10.0
libtpu: 0.0.40
codegen_flags: <defaults>
</compile_context>

<pallas_src>
import jax
import jax.numpy as jnp
from jax import lax
from jax.experimental import pallas as pl
from jax.experimental.pallas import tpu as pltpu


_LANE = 128
_DEFAULT_TILE_B = 8192     # review: 8-16K amortizes ~0.35 us/step grid overhead
_MIN_PALLAS_BATCH = 128    # below this, a kernel launch is pure fixed-cost overhead


def _grad_mlp_kernel(x_ref, w1_ref, b1_ref, w2_ref, b2_ref, w2b_ref, w1b_ref, out_ref):
    """Closed-form gradient of the scalar MLP; batch on the 128-lane axis."""
    x = x_ref[...]                                   # (TB, D)  caller dtype, natural layout
    w1 = w1_ref[...].astype(x.dtype)                 # (H, D)   bf16 in HBM
    b1 = b1_ref[...]                                 # (H, 1)   f32
    w2 = w2_ref[...].astype(jnp.float32)             # (H, H)
    b2 = b2_ref[...]                                 # (H, 1)   f32
    w2b = w2b_ref[...].astype(jnp.float32)           # (H, H) = W2^T col-scaled by sign*w3
    w1b = w1b_ref[...].astype(jnp.float32)           # (D, H) = W1^T

    # forward pass (MXU): z1 = W1 @ X^T without materializing X^T anywhere -
    # NT contraction over the D axes consumes the (TB, D) tile directly.
    z1 = lax.dot_general(w1, x, (((1,), (1,)), ((), ())),
                         preferred_element_type=jnp.float32) + b1       # (H, TB)
    a1 = jnp.tanh(z1)
    z2 = jnp.dot(w2, a1, preferred_element_type=jnp.float32) + b2       # (H, TB)
    a2 = jnp.tanh(z2)

    # backward pass: sign and w3 already folded into w2b (no extra scaling).
    g1 = (1.0 - a1 * a1) * jnp.dot(w2b, 1.0 - a2 * a2,
                                   preferred_element_type=jnp.float32)  # (H, TB)
    grad_t = jnp.dot(w1b, g1, preferred_element_type=jnp.float32)       # (D, TB)
    # Single in-kernel transpose back to the natural (TB, D) layout; the XLU
    # slot is idle in this kernel so this is effectively free (and avoids a
    # full wrapper-side HBM round trip for the transpose).
    out_ref[...] = grad_t.T.astype(out_ref.dtype)                       # (TB, D)


def _grad_closed_form(x2d, params, sign):
    """Plain-JAX closed form for tiny batches / 1-D inputs (no kernel launch)."""
    w1, b1, w2, b2, w3, _b3 = params
    x2d = x2d.astype(jnp.float32)
    a1 = jnp.tanh(x2d @ w1.T + b1)
    a2 = jnp.tanh(a1 @ w2.T + b2)
    g2 = (1.0 - a2 * a2) * w3
    g1 = (1.0 - a1 * a1) * (g2 @ w2)
    return sign * (g1 @ w1)


def _prep_weights(params, sign, weight_dtype):
    """One-time weight prep: fold sign*w3 into W2^T, pre-transpose W1, cast to
    the (bf16) storage dtype.  Biases stay f32; accumulation is always f32."""
    w1, b1, w2, b2, w3, _b3 = params
    H = w1.shape[0]
    s = jnp.float32(sign) * w3.reshape(-1).astype(jnp.float32)            # (H,)
    w1_c = w1.astype(weight_dtype)                                        # (H, D)
    w2_c = w2.astype(weight_dtype)                                        # (H, H)
    w2b_c = (w2.astype(jnp.float32).T * s[None, :]).astype(weight_dtype)  # (H, H)
    w1b_c = w1.astype(jnp.float32).T.astype(weight_dtype)                 # (D, H)
    b1_c = b1.reshape(H, 1).astype(jnp.float32)
    b2_c = b2.reshape(H, 1).astype(jnp.float32)
    return w1_c, b1_c, w2_c, b2_c, w2b_c, w1b_c


def _grad_pallas(x2d, params, sign, tile_b, weight_dtype):
    B, D = x2d.shape
    H = params[0].shape[0]
    w1_c, b1_c, w2_c, b2_c, w2b_c, w1b_c = _prep_weights(params, sign, weight_dtype)

    # Tile the batch in its natural (B, D) layout: no pad, no transpose, ragged
    # last block handled by Pallas.  Pick tb so there are >= 2 tiles whenever
    # possible so dimension_semantics=("parallel",) engages both v7x TCs.
    half = (B // 2 // _LANE) * _LANE
    tb = min(tile_b, max(_LANE, half))
    grid = (pl.cdiv(B, tb),)

    # VMEM budget from the real footprint (double-buffered x/out tiles,
    # resident weights, f32 (H, tb) intermediates), clamped to [16, 32] MiB so
    # it never approaches v7x's 64 MiB physical VMEM.
    xb = x2d.dtype.itemsize
    wbytes = 2 * (w1_c.size + w2_c.size + w2b_c.size + w1b_c.size)
    footprint = (2 * tb * D * xb            # x tile, double buffered
                 + 2 * tb * D * 4           # out tile, double buffered
                 + 2 * wbytes + 4 * H * 4   # resident weights + biases (x2 buffers)
                 + 10 * H * tb * 4          # in-kernel f32 intermediates
                 + tb * D * 4)              # transposed result
    vmem_limit = int(min(32 << 20, max(16 << 20, int(footprint * 1.5))))

    cost = pl.CostEstimate(
        flops=4 * B * H * (D + H),
        transcendentals=2 * B * H,
        bytes_accessed=B * D * (xb + 4) + wbytes + 8 * H,
    )

    grad = pl.pallas_call(
        _grad_mlp_kernel,
        out_shape=jax.ShapeDtypeStruct((B, D), jnp.float32),
        grid_spec=pltpu.PrefetchScalarGridSpec(
            num_scalar_prefetch=0,
            grid=grid,
            in_specs=[
                # x tile, tiled over the batch in its natural layout.
                # TODO(synk): on v5e, if a bundle dump shows exposed DMA, add
                # pipeline_mode=pl.Buffered(3) to this spec.
                pl.BlockSpec((tb, D), lambda i: (i, 0)),
                # Resident (constant-index) weights - fetched once, reused for
                # every grid step.
                # TODO(synk): mark these pipeline_mode=pl.Buffered(1) (or pack
                # into one operand) to drop their second VMEM buffer; low prio.
                pl.BlockSpec((H, D), lambda i: (0, 0)),    # W1
                pl.BlockSpec((H, 1), lambda i: (0, 0)),    # b1
                pl.BlockSpec((H, H), lambda i: (0, 0)),    # W2
                pl.BlockSpec((H, 1), lambda i: (0, 0)),    # b2
                pl.BlockSpec((H, H), lambda i: (0, 0)),    # W2^T * sign*w3
                pl.BlockSpec((D, H), lambda i: (0, 0)),    # W1^T
            ],
            out_specs=pl.BlockSpec((tb, D), lambda i: (i, 0)),
        ),
        compiler_params=pltpu.CompilerParams(
            dimension_semantics=("parallel",),             # shard batch tiles across TCs
            vmem_limit_bytes=vmem_limit,
        ),
        cost_estimate=cost,
    )(x2d, w1_c, b1_c, w2_c, b2_c, w2b_c, w1b_c)

    return grad


def gradient_wrapper_forward(x, params, *, positive=True, tile_b=_DEFAULT_TILE_B,
                             weight_dtype=jnp.bfloat16):
    """JAX equivalent of GradientWrapper.forward for the MLP potential net."""
    sign = 1.0 if positive else -1.0

    if x.ndim == 1:
        # functorch.grad path: single sample, closed form in plain JAX.
        return _grad_closed_form(x[None, :], params, sign)[0]
    elif x.ndim >= 2:
        lead = x.shape[:-1]
        d = x.shape[-1]
        x2d = x.reshape((-1, d))
        if x2d.shape[0] < _MIN_PALLAS_BATCH:
            grad = _grad_closed_form(x2d, params, sign)
        else:
            grad = _grad_pallas(x2d, params, sign, tile_b, weight_dtype)
        return grad.reshape(lead + (d,))
    else:
        raise Exception(f"Invalid tensor of shape {x.shape} passed")


def _init_params(key, d_in, hidden):
    k1, k2, k3, k4, k5, k6 = jax.random.split(key, 6)
    w1 = jax.random.normal(k1, (hidden, d_in), jnp.float32) * 0.3
    b1 = jax.random.normal(k2, (hidden,), jnp.float32) * 0.1
    w2 = jax.random.normal(k3, (hidden, hidden), jnp.float32) * 0.3
    b2 = jax.random.normal(k4, (hidden,), jnp.float32) * 0.1
    w3 = jax.random.normal(k5, (1, hidden), jnp.float32) * 0.3
    b3 = jax.random.normal(k6, (1,), jnp.float32) * 0.1
    return (w1, b1, w2, b2, w3, b3)


def _scalar_net_ref(params, x):
    """Pure-JAX reference of the wrapped scalar net (single sample x: (D,))."""
    w1, b1, w2, b2, w3, b3 = params
    a1 = jnp.tanh(x @ w1.T + b1)
    a2 = jnp.tanh(a1 @ w2.T + b2)
    return jnp.squeeze(a2 @ w3.T + b3)


if __name__ == "__main__":
    key = jax.random.PRNGKey(0)
    kx, kx2, kp = jax.random.split(key, 3)

    D, H = 16, 32
    params = _init_params(kp, D, H)

    grad_ref_fn = jax.vmap(jax.grad(lambda xi: _scalar_net_ref(params, xi)))

    # Reference with the same bf16-quantised weights the kernel uses (biases
    # stay f32) -- isolates kernel correctness from the quantisation itself.
    params_q = (params[0].astype(jnp.bfloat16).astype(jnp.float32), params[1],
                params[2].astype(jnp.bfloat16).astype(jnp.float32), params[3],
                params[4].astype(jnp.bfloat16).astype(jnp.float32), params[5])

    # 1) Batched path through the Pallas kernel (f32 x, bf16 resident weights).
    B = 512
    x = jax.random.normal(kx, (B, D), jnp.float32)
    out = jax.block_until_ready(gradient_wrapper_forward(x, params, positive=True))
    assert out.shape == (B, D)
    ref_q = _grad_closed_form(x, params_q, 1.0)
    assert jnp.allclose(out, ref_q, atol=1e-2, rtol=1e-2), "mismatch vs quantised-weight ref"
    ref = grad_ref_fn(x)  # loose check vs the exact f32 jax.grad reference (bf16 weights)
    assert jnp.allclose(out, ref, atol=5e-2, rtol=5e-2), "mismatch vs f32 jax.grad reference"

    # 2) Non-multiple-of-128 batch (ragged last grid block), positive=False.
    Bo = 300
    xo = jax.random.normal(kx2, (Bo, D), jnp.float32)
    out_o = jax.block_until_ready(gradient_wrapper_forward(xo, params, positive=False))
    assert out_o.shape == (Bo, D)
    assert jnp.allclose(out_o, -_grad_closed_form(xo, params_q, 1.0), atol=1e-2, rtol=1e-2), \
        "mismatch on ragged batch"

    # 3) bf16 activations: kernel reads half the x bytes (no wrapper-side cast).
    x_bf = x.astype(jnp.bfloat16)
    out_bf = jax.block_until_ready(gradient_wrapper_forward(x_bf, params, positive=True))
    ref_bf = _grad_closed_form(x_bf.astype(jnp.float32), params_q, 1.0)
    assert out_bf.shape == (B, D)
    assert jnp.allclose(out_bf, ref_bf, atol=1e-2, rtol=1e-2), "mismatch on bf16-x path"

    # 4) 1-D (unbatched) and tiny-batch paths (plain-JAX closed form, f32 exact).
    out1 = jax.block_until_ready(gradient_wrapper_forward(xo[0], params, positive=False))
    ref1 = -jax.grad(lambda xi: _scalar_net_ref(params, xi))(xo[0])
    assert out1.shape == (D,)
    assert jnp.allclose(out1, ref1, atol=1e-4, rtol=1e-4), "mismatch on 1-D path"

    out_small = jax.block_until_ready(gradient_wrapper_forward(xo[:8], params))
    assert jnp.allclose(out_small, grad_ref_fn(xo[:8]), atol=1e-4, rtol=1e-4)

    print("KERNEL_OK")
</pallas_src>

<mosaic_0001>
module attributes {stable_mosaic.version = 11 : i64} {
  func.func @_grad_mlp_kernel(%arg0: i32, %arg1: memref<256x16xf32, #tpu.memory_space<vmem>>, %arg2: memref<32x16xbf16, #tpu.memory_space<vmem>>, %arg3: memref<32x1xf32, #tpu.memory_space<vmem>>, %arg4: memref<32x32xbf16, #tpu.memory_space<vmem>>, %arg5: memref<32x1xf32, #tpu.memory_space<vmem>>, %arg6: memref<32x32xbf16, #tpu.memory_space<vmem>>, %arg7: memref<16x32xbf16, #tpu.memory_space<vmem>>, %arg8: memref<256x16xf32, #tpu.memory_space<vmem>>) attributes {dimension_semantics = [#tpu.dimension_semantics<parallel>], iteration_bounds = array<i64: 2>, scalar_prefetch = 0 : i64, scratch_operands = 0 : i64, tpu.core_type = #tpu.core_type<tc>, window_params = [{transform_indices = @transform_0, window_bounds = array<i64: 256, 16>}, {pipeline_mode = #tpu.pipeline_mode<synchronous>, transform_indices = @transform_1, window_bounds = array<i64: 32, 16>}, {pipeline_mode = #tpu.pipeline_mode<synchronous>, transform_indices = @transform_2, window_bounds = array<i64: 32, 1>}, {pipeline_mode = #tpu.pipeline_mode<synchronous>, transform_indices = @transform_3, window_bounds = array<i64: 32, 32>}, {pipeline_mode = #tpu.pipeline_mode<synchronous>, transform_indices = @transform_4, window_bounds = array<i64: 32, 1>}, {pipeline_mode = #tpu.pipeline_mode<synchronous>, transform_indices = @transform_5, window_bounds = array<i64: 32, 32>}, {pipeline_mode = #tpu.pipeline_mode<synchronous>, transform_indices = @transform_6, window_bounds = array<i64: 16, 32>}, {transform_indices = @transform_7, window_bounds = array<i64: 256, 16>}]} {
    %c0 = arith.constant 0 : index
    %c0_0 = arith.constant 0 : index
    %0 = vector.load %arg1[%c0, %c0_0] : memref<256x16xf32, #tpu.memory_space<vmem>>, vector<256x16xf32>
    %c0_1 = arith.constant 0 : index
    %c0_2 = arith.constant 0 : index
    %1 = vector.load %arg2[%c0_1, %c0_2] : memref<32x16xbf16, #tpu.memory_space<vmem>>, vector<32x16xbf16>
    %2 = arith.extf %1 : vector<32x16xbf16> to vector<32x16xf32>
    %c0_3 = arith.constant 0 : index
    %c0_4 = arith.constant 0 : index
    %3 = vector.load %arg3[%c0_3, %c0_4] : memref<32x1xf32, #tpu.memory_space<vmem>>, vector<32x1xf32>
    %c0_5 = arith.constant 0 : index
    %c0_6 = arith.constant 0 : index
    %4 = vector.load %arg4[%c0_5, %c0_6] : memref<32x32xbf16, #tpu.memory_space<vmem>>, vector<32x32xbf16>
    %5 = arith.extf %4 : vector<32x32xbf16> to vector<32x32xf32>
    %c0_7 = arith.constant 0 : index
    %c0_8 = arith.constant 0 : index
    %6 = vector.load %arg5[%c0_7, %c0_8] : memref<32x1xf32, #tpu.memory_space<vmem>>, vector<32x1xf32>
    %c0_9 = arith.constant 0 : index
    %c0_10 = arith.constant 0 : index
    %7 = vector.load %arg6[%c0_9, %c0_10] : memref<32x32xbf16, #tpu.memory_space<vmem>>, vector<32x32xbf16>
    %8 = arith.extf %7 : vector<32x32xbf16> to vector<32x32xf32>
    %c0_11 = arith.constant 0 : index
    %c0_12 = arith.constant 0 : index
    %9 = vector.load %arg7[%c0_11, %c0_12] : memref<16x32xbf16, #tpu.memory_space<vmem>>, vector<16x32xbf16>
    %10 = arith.extf %9 : vector<16x32xbf16> to vector<16x32xf32>
    %cst = arith.constant dense<0.000000e+00> : vector<32x256xf32>
    %11 = tpu.matmul %2, %0, %cst {dimension_numbers = #tpu.dot_dimension_numbers<[1], [1], [0], [0], [0, 0, 1, 0], [], []>} : vector<32x16xf32>, vector<256x16xf32>, vector<32x256xf32> -> vector<32x256xf32>
    %12 = vector.broadcast %3 : vector<32x1xf32> to vector<32x256xf32>
    %13 = arith.addf %11, %12 : vector<32x256xf32>
    %14 = math.tanh %13 : vector<32x256xf32>
    %cst_13 = arith.constant dense<0.000000e+00> : vector<32x256xf32>
    %15 = tpu.matmul %5, %14, %cst_13 {dimension_numbers = #tpu.dot_dimension_numbers<[1], [0], [0], [1], [0, 0, 1, 1], [], []>} : vector<32x32xf32>, vector<32x256xf32>, vector<32x256xf32> -> vector<32x256xf32>
    %16 = vector.broadcast %6 : vector<32x1xf32> to vector<32x256xf32>
    %17 = arith.addf %15, %16 : vector<32x256xf32>
    %18 = math.tanh %17 : vector<32x256xf32>
    %19 = arith.mulf %14, %14 : vector<32x256xf32>
    %cst_14 = arith.constant 1.000000e+00 : f32
    %20 = vector.broadcast %cst_14 : f32 to vector<32x256xf32>
    %21 = arith.subf %20, %19 : vector<32x256xf32>
    %22 = arith.mulf %18, %18 : vector<32x256xf32>
    %cst_15 = arith.constant 1.000000e+00 : f32
    %23 = vector.broadcast %cst_15 : f32 to vector<32x256xf32>
    %24 = arith.subf %23, %22 : vector<32x256xf32>
    %cst_16 = arith.constant dense<0.000000e+00> : vector<32x256xf32>
    %25 = tpu.matmul %8, %24, %cst_16 {dimension_numbers = #tpu.dot_dimension_numbers<[1], [0], [0], [1], [0, 0, 1, 1], [], []>} : vector<32x32xf32>, vector<32x256xf32>, vector<32x256xf32> -> vector<32x256xf32>
    %26 = arith.mulf %21, %25 : vector<32x256xf32>
    %cst_17 = arith.constant dense<0.000000e+00> : vector<16x256xf32>
    %27 = tpu.matmul %10, %26, %cst_17 {dimension_numbers = #tpu.dot_dimension_numbers<[1], [0], [0], [1], [0, 0, 1, 1], [], []>} : vector<16x32xf32>, vector<32x256xf32>, vector<16x256xf32> -> vector<16x256xf32>
    %28 = tpu.transpose %27, [1, 0] : vector<16x256xf32> -> vector<256x16xf32>
    %c0_18 = arith.constant 0 : index
    %c0_19 = arith.constant 0 : index
    %29 = vector.load %arg8[%c0_18, %c0_19] : memref<256x16xf32, #tpu.memory_space<vmem>>, vector<256x16xf32>
    tpu.vector_store %arg8[%c0_18, %c0_19], %28 {strides = array<i32>} : memref<256x16xf32, #tpu.memory_space<vmem>>, vector<256x16xf32>,
    return
  }
  func.func @transform_0(%arg0: i32) -> (i32, i32) {
    %c0_i32 = arith.constant 0 : i32
    %c0_i32_0 = arith.constant 0 : i32
    return %arg0, %c0_i32 : i32, i32
  }
  func.func @transform_1(%arg0: i32) -> (i32, i32) {
    %c0_i32 = arith.constant 0 : i32
    %c0_i32_0 = arith.constant 0 : i32
    %c0_i32_1 = arith.constant 0 : i32
    return %c0_i32, %c0_i32_0 : i32, i32
  }
  func.func @transform_2(%arg0: i32) -> (i32, i32) {
    %c0_i32 = arith.constant 0 : i32
    %c0_i32_0 = arith.constant 0 : i32
    %c0_i32_1 = arith.constant 0 : i32
    return %c0_i32, %c0_i32_0 : i32, i32
  }
  func.func @transform_3(%arg0: i32) -> (i32, i32) {
    %c0_i32 = arith.constant 0 : i32
    %c0_i32_0 = arith.constant 0 : i32
    %c0_i32_1 = arith.constant 0 : i32
    return %c0_i32, %c0_i32_0 : i32, i32
  }
  func.func @transform_4(%arg0: i32) -> (i32, i32) {
    %c0_i32 = arith.constant 0 : i32
    %c0_i32_0 = arith.constant 0 : i32
    %c0_i32_1 = arith.constant 0 : i32
    return %c0_i32, %c0_i32_0 : i32, i32
  }
  func.func @transform_5(%arg0: i32) -> (i32, i32) {
    %c0_i32 = arith.constant 0 : i32
    %c0_i32_0 = arith.constant 0 : i32
    %c0_i32_1 = arith.constant 0 : i32
    return %c0_i32, %c0_i32_0 : i32, i32
  }
  func.func @transform_6(%arg0: i32) -> (i32, i32) {
    %c0_i32 = arith.constant 0 : i32
    %c0_i32_0 = arith.constant 0 : i32
    %c0_i32_1 = arith.constant 0 : i32
    return %c0_i32, %c0_i32_0 : i32, i32
  }
  func.func @transform_7(%arg0: i32) -> (i32, i32) {
    %c0_i32 = arith.constant 0 : i32
    %c0_i32_0 = arith.constant 0 : i32
    return %arg0, %c0_i32 : i32, i32
  }
}

</mosaic_0001>

<bundles_post_ra>
// kernel: tpu_custom_call.1
= control target key start
LH: loop header
LB: loop body
LE: loop exit
PB: predicated region body
PF: predicated region fallthrough
CT: control target
= control target key end

     0   :  { %s1376_s24 = smov 0   ;;  %s1659_s0 = inlined_call_operand.vmem [shape: f32[512,16], index: 0, kind: input, shape index: {}]   ;;  %s1660_s1 = inlined_call_operand.vmem [shape: bf16[32,16], index: 1, kind: input, shape index: {}]   ;;  %s1661_s2 = inlined_call_operand.vmem [shape: f32[32,1], index: 2, kind: input, shape index: {}]   ;;  %s1662_s3 = inlined_call_operand.vmem [shape: bf16[32,32], index: 3, kind: input, shape index: {}]   ;;  %s1663_s4 = inlined_call_operand.vmem [shape: f32[32,1], index: 4, kind: input, shape index: {}]   ;;  %s1664_s5 = inlined_call_operand.vmem [shape: bf16[32,32], index: 5, kind: input, shape index: {}]   ;;  %s1665_s6 = inlined_call_operand.vmem [shape: bf16[16,32], index: 6, kind: input, shape index: {}]   ;;  %s1666_s7 = inlined_call_operand.vmem [shape: f32[512,16], index: 7, kind: output, shape index: {}]  }
   0x1 LB: > { %s1082_s25 = sadd.s32 4294967295, %s1332_s24   ;;  %p1086_p0 = scmp.ge.s32.totalorder %s1332_s24, 1  ;;  %s1332_s24 = sphi %s1376_s24, %s17_s24  }
   0x2   : > { %p238_p1 = scmp.lt.s32.totalorder %s1332_s24, 3 }
   0x4   : > { %p239_p2 = pnand %p1086_p0, %p238_p1 }
   0x5   : > { %s1087_s26 = sshll.u32 (!%p239_p2), %s1082_s25, 5  ;;  %v1387_v0 = vld [vmem:[%s1660_s1] sm:$0xff] (!%p239_p2)   ;;  %v1334_v3 = vmov (!%p239_p2), 0   ;;  %v324_v4 = vld [vmem:[%s1661_s2 + $0x10] sm:$0xff] (!%p239_p2)  ;;  %vm370_vm0 = vcmask (!%p239_p2), 130048   ;;  %v323_v5 = vld [vmem:[%s1661_s2 + $0x8] sm:$0xff] (!%p239_p2) }
   0x6   : > { %242 = sbr.rel (%p239_p2) target bundleno = 1211 (0x4bb), region = 48  ;;  %v322_v1 = vld [vmem:[%s1661_s2] sm:$0xff] (!%p239_p2)  ;;  %p271_p3 = scmp.lt.s32.totalorder (!%p239_p2), %s1087_s26, 63  ;;  %v1141_v2 = vunpack.c.l.bf16 (!%p239_p2), %v1387_v0  ;;  %1292 = vset.pattern.permute.xlu0 (!%p239_p2), %v1334_v3  ;;  %1293 = vset.pattern.permute.xlu1 (!%p239_p2), %v1334_v3  ;;  %v325_v6 = vld [vmem:[%s1661_s2 + $0x18] sm:$0xff] (!%p239_p2)  ;;  %vm1417_vm1 = vmpackc.low (!%p239_p2), %vm370_vm0, %vm370_vm0  ;;  %v1142_v60 = vunpack.c.h.bf16 (!%p239_p2), %v1387_v0  ;;  %vm596_vm2 = vcmask (!%p239_p2), 261120  }
   0x7   : > { %352 = vperm.xlu0 (!%p239_p2), %1292, %v322_v1   ;;  %362 = vperm.xlu1 (!%p239_p2), %1293, %v324_v4   ;;  %v334_v8 = vld [vmem:[%s1663_s4] sm:$0xff] (!%p239_p2)  ;;  %v335_v9 = vld [vmem:[%s1663_s4 + $0x8] sm:$0xff] (!%p239_p2)  ;;  %v336_v19 = vld [vmem:[%s1663_s4 + $0x10] sm:$0xff] (!%p239_p2)  ;;  %v1335_v1 = vmov (!%p239_p2), 0.0  }
   0x8   : > { %1202 = vmatprep.mubr.msk.f32.mxu0 (!%p239_p2), %vm370_vm0, %v1141_v2  ;;  %v337_v22 = vld [vmem:[%s1663_s4 + $0x18] sm:$0xff] (!%p239_p2)  ;;  %v1167_v61 = vld [vmem:[%s1660_s1 + $0x8] sm:$0xff] (!%p239_p2)   ;;  %673 = vmatprep.mubr.f32.mxu1 (!%p239_p2), %v1335_v1 }
   0x9   : > { %v1145_v62 = vunpack.c.l.bf16 (!%p239_p2), %v1167_v61  ;;  %v1146_v63 = vunpack.c.h.bf16 (!%p239_p2), %v1167_v61 }
   0xb   : > { %357 = vperm.xlu0 (!%p239_p2), %1292, %v323_v5   ;;  %367 = vperm.xlu1 (!%p239_p2), %1293, %v325_v6  }
   0xd   : > { %s1670_s26 = smov (!%p271_p3, %s1087_s26), 63 }
   0xe   : > { %s1088_s14 = sshll.u32 %s1670_s26, 3 }
   0xf   : > { %s1413_s17 = scalar_lea.vmem %s1659_s0, %s1088_s14  ;;  %578 = vperm.xlu0 %1292, %v334_v8   ;;  %583 = vperm.xlu1 %1293, %v335_v9   ;;  %s1590_s20 = scalar_lea.vmem %s1666_s7, %s1088_s14 }
  0x10   : > { %v298_v10 = vld [vmem:[%s1413_s17 + $0x80] sm:$0xff]  ;;  %v299_v11 = vld [vmem:[%s1413_s17 + $0x88] sm:$0xff]  ;;  %v300_v15 = vld [vmem:[%s1413_s17 + $0x90] sm:$0xff] }
  0x11   : > { %v282_v12 = vld [vmem:[%s1413_s17] sm:$0xff]  ;;  %v1210_v13 = vpack.c.bf16 %v299_v11, %v298_v10  ;;  %v283_v14 = vld [vmem:[%s1413_s17 + $0x8] sm:$0xff]  ;;  %v301_v16 = vld [vmem:[%s1413_s17 + $0x98] sm:$0xff] }
  0x12   : > { %v1213_v17 = vpack.c.bf16 %v283_v14, %v282_v12  ;;  %v1216_v18 = vpack.c.bf16 %v301_v16, %v300_v15  ;;  %v284_v20 = vld [vmem:[%s1413_s17 + $0x10] sm:$0xff]  ;;  %v285_v21 = vld [vmem:[%s1413_s17 + $0x18] sm:$0xff]  ;;  %v302_v23 = vld [vmem:[%s1413_s17 + $0xa0] sm:$0xff] }
  0x13   : > { %1212 = vmatprep.subr.msk.bf16.mxu0 %vm1417_vm1, %v1210_v13  ;;  %v303_v24 = vld [vmem:[%s1413_s17 + $0xa8] sm:$0xff]  ;;  %588 = vperm.xlu0 %1292, %v336_v19   ;;  %v1219_v25 = vpack.c.bf16 %v285_v21, %v284_v20  ;;  %v286_v27 = vld [vmem:[%s1413_s17 + $0x20] sm:$0xff]  ;;  %v304_v29 = vld [vmem:[%s1413_s17 + $0xb0] sm:$0xff] }
  0x14   : > { %1215 = vmatpush3.bf16.xpose.msk.msra.mxu0 %vm1417_vm1, %v1213_v17  ;;  %593 = vperm.xlu1 %1293, %v337_v22   ;;  %v1222_v26 = vpack.c.bf16 %v303_v24, %v302_v23  ;;  %v287_v28 = vld [vmem:[%s1413_s17 + $0x28] sm:$0xff]  ;;  %v305_v30 = vld [vmem:[%s1413_s17 + $0xb8] sm:$0xff]  ;;  %v288_v33 = vld [vmem:[%s1413_s17 + $0x30] sm:$0xff] }
  0x15   : > { %1218 = vmatprep.subr.msk.bf16.mxu0 %vm1417_vm1, %v1216_v18  ;;  %v1225_v31 = vpack.c.bf16 %v287_v28, %v286_v27  ;;  %v1228_v32 = vpack.c.bf16 %v305_v30, %v304_v29  ;;  %v289_v34 = vld [vmem:[%s1413_s17 + $0x38] sm:$0xff]  ;;  %v306_v35 = vld [vmem:[%s1413_s17 + $0xc0] sm:$0xff]  ;;  %v307_v36 = vld [vmem:[%s1413_s17 + $0xc8] sm:$0xff] }
  0x16   : > { %v1231_v37 = vpack.c.bf16 %v289_v34, %v288_v33  ;;  %v1234_v38 = vpack.c.bf16 %v307_v36, %v306_v35  ;;  %v290_v39 = vld [vmem:[%s1413_s17 + $0x40] sm:$0xff]  ;;  %v291_v40 = vld [vmem:[%s1413_s17 + $0x48] sm:$0xff]  ;;  %v308_v41 = vld [vmem:[%s1413_s17 + $0xd0] sm:$0xff] }
  0x17   : > { %v309_v42 = vld [vmem:[%s1413_s17 + $0xd8] sm:$0xff]  ;;  %v1237_v43 = vpack.c.bf16 %v291_v40, %v290_v39  ;;  %v292_v45 = vld [vmem:[%s1413_s17 + $0x50] sm:$0xff]  ;;  %v310_v47 = vld [vmem:[%s1413_s17 + $0xe0] sm:$0xff] }
  0x18   : > { %v1240_v44 = vpack.c.bf16 %v309_v42, %v308_v41  ;;  %v293_v46 = vld [vmem:[%s1413_s17 + $0x58] sm:$0xff]  ;;  %v311_v48 = vld [vmem:[%s1413_s17 + $0xe8] sm:$0xff]  ;;  %v294_v51 = vld [vmem:[%s1413_s17 + $0x60] sm:$0xff] }
  0x19   : > { %v1243_v49 = vpack.c.bf16 %v293_v46, %v292_v45  ;;  %v1246_v50 = vpack.c.bf16 %v311_v48, %v310_v47  ;;  %v295_v52 = vld [vmem:[%s1413_s17 + $0x68] sm:$0xff]  ;;  %v312_v53 = vld [vmem:[%s1413_s17 + $0xf0] sm:$0xff]  ;;  %v313_v54 = vld [vmem:[%s1413_s17 + $0xf8] sm:$0xff] }
  0x1a   : > { %v1249_v55 = vpack.c.bf16 %v295_v52, %v294_v51  ;;  %v1252_v56 = vpack.c.bf16 %v313_v54, %v312_v53  ;;  %v296_v57 = vld [vmem:[%s1413_s17 + $0x70] sm:$0xff]  ;;  %v297_v58 = vld [vmem:[%s1413_s17 + $0x78] sm:$0xff]  ;;  %v1168_v36 = vld [vmem:[%s1662_s3 + $0x8] sm:$0xff]  }
  0x1b   : > { %v1255_v59 = vpack.c.bf16 %v297_v58, %v296_v57 }
  0x1c   : > { %1221 = vmatpush3.bf16.xpose.msk.msra.mxu0 %vm1417_vm1, %v1219_v25 }
  0x1d   : > { %1224 = vmatprep.subr.msk.bf16.mxu0 %vm1417_vm1, %v1222_v26 }
  0x24   : > { %1227 = vmatpush3.bf16.xpose.msk.msra.mxu0 %vm1417_vm1, %v1225_v31 }
  0x25   : > { %1230 = vmatprep.subr.msk.bf16.mxu0 %vm1417_vm1, %v1228_v32  ;;  %v1148_v32 = vld [vmem:[%s1662_s3] sm:$0xff]  }
  0x26   : > { %v1149_v34 = vunpack.c.l.bf16 %v1148_v32  ;;  %v1150_v35 = vunpack.c.h.bf16 %v1148_v32 }
  0x2c   : > { %1233 = vmatpush3.bf16.xpose.msk.msra.mxu0 %vm1417_vm1, %v1231_v37  ;;  %v1153_v37 = vunpack.c.l.bf16 %v1168_v36 }
  0x2d   : > { %1236 = vmatprep.subr.msk.bf16.mxu0 %vm1417_vm1, %v1234_v38  ;;  %v1154_v38 = vunpack.c.h.bf16 %v1168_v36 }
  0x34   : > { %1239 = vmatpush3.bf16.xpose.msk.msra.mxu0 %vm1417_vm1, %v1237_v43 }
  0x35   : > { %1242 = vmatprep.subr.msk.bf16.mxu0 %vm1417_vm1, %v1240_v44 }
  0x3c   : > { %1245 = vmatpush3.bf16.xpose.msk.msra.mxu0 %vm1417_vm1, %v1243_v49 }
  0x3d   : > { %1248 = vmatprep.subr.msk.bf16.mxu0 %vm1417_vm1, %v1246_v50 }
  0x44   : > { %1251 = vmatpush3.bf16.xpose.msk.msra.mxu0 %vm1417_vm1, %v1249_v55 }
  0x45   : > { %1254 = vmatprep.subr.msk.bf16.mxu0 %vm1417_vm1, %v1252_v56 }
  0x4c   : > { %1257 = vmatpush3.bf16.xpose.msk.msra.mxu0 %vm1417_vm1, %v1255_v59 }
  0x53   : > { %1203 = vmatmul.mubr.msk.f32.vlgmr.msra.gmra.mrb[0].mxu0 %vm370_vm0, %v1141_v2 }
  0x54   : > { %1204 = vmatprep.mubr.msk.f32.mxu0 %vm370_vm0, %v1142_v60 }
  0x57   : > { %1205 = vmatmul.mubr.msk.f32.gmra.mrb[2].mxu0 %vm370_vm0, %v1142_v60 }
  0x58   : > { %1206 = vmatprep.mubr.msk.f32.mxu0 %vm370_vm0, %v1145_v62 }
  0x5b   : > { %1207 = vmatmul.mubr.msk.f32.gmra.mrb[4].mxu0 %vm370_vm0, %v1145_v62 }
  0x5c   : > { %1208 = vmatprep.mubr.msk.f32.mxu0 %vm370_vm0, %v1146_v63 }
  0x5f   : > { %1209 = vmatmul.mubr.msk.f32.gmra.mrb[6].mxu0 %vm370_vm0, %v1146_v63 }
  0x86   : > { %v353_v0 = vpop.permute.xlu0 %352  ;;  %v363_v10 = vpop.permute.xlu1 %362 }
  0x8a   : > { %v358_v6 = vpop.permute.xlu0 %357  ;;  %v368_v16 = vpop.permute.xlu1 %367 }
  0x8e   : > { %v579_v39 = vpop.permute.xlu0 %578  ;;  %v584_v44 = vpop.permute.xlu1 %583 }
  0x92   : > { %v589_v49 = vpop.permute.xlu0 %588 }
  0x93   : > { %v594_v54 = vpop.permute.xlu1 %593 }
 0x126   : > { %v545_v3 = vpop.f32.mrb[0].mxu0 }
 0x127   : > { %v546_v2 = vadd.f32 %v545_v3, %v353_v0  ;;  %v547_v4 = vpop.f32.mrb[1].mxu0 }
 0x128   : > { %v548_v5 = vadd.f32 %v547_v4, %v353_v0 }
 0x129   : > { %1294 = vtanh.f32 %v546_v2 }
 0x12a   : > { %v551_v7 = vpop.f32.mrb[2].mxu0  ;;  %1296 = vtanh.f32 %v548_v5 }
 0x12b   : > { %v552_v8 = vadd.f32 %v551_v7, %v358_v6  ;;  %v553_v9 = vpop.f32.mrb[3].mxu0 }
 0x12c   : > { %v554_v11 = vadd.f32 %v553_v9, %v358_v6 }
 0x12d   : > { %1298 = vtanh.f32 %v552_v8 }
 0x12e   : > { %1300 = vtanh.f32 %v554_v11  ;;  %v557_v12 = vpop.f32.mrb[4].mxu0 }
 0x12f   : > { %v558_v13 = vadd.f32 %v557_v12, %v363_v10  ;;  %v559_v14 = vpop.f32.mrb[5].mxu0 }
 0x130   : > { %v560_v15 = vadd.f32 %v559_v14, %v363_v10 }
 0x131   : > { %1302 = vtanh.f32 %v558_v13 }
 0x132   : > { %v563_v17 = vpop.f32.mrb[6].mxu0  ;;  %1304 = vtanh.f32 %v560_v15 }
 0x133   : > { %v564_v18 = vadd.f32 %v563_v17, %v368_v16  ;;  %v565_v19 = vpop.f32.mrb[7].mxu0  ;;  %v1511_v21 = vpop.eup %1294 }
 0x134   : > { %v566_v20 = vadd.f32 %v565_v19, %v368_v16  ;;  %v1513_v22 = vpop.eup %1296 }
 0x135   : > { %1306 = vtanh.f32 %v564_v18 }
 0x136   : > { %1308 = vtanh.f32 %v566_v20 }
 0x137   : > { %v1515_v23 = vpop.eup %1298 }
 0x138   : > { %v1517_v24 = vpop.eup %1300  ;;  %v1260_v25 = vpack.c.bf16 %v1515_v23, %v1511_v21 }
 0x139   : > { %v1258_v26 = vpack.c.bf16 %v1517_v24, %v1513_v22 }
 0x13b   : > { %1259 = vmatprep.subr.bf16.mxu1 %v1258_v26  ;;  %v1523_v27 = vpop.eup %1302 }
 0x13c   : > { %1261 = vmatpush1.bf16.msra.mxu1 %v1260_v25  ;;  %v1525_v28 = vpop.eup %1304 }
 0x13f   : > { %v1527_v29 = vpop.eup %1306 }
 0x140   : > { %v1529_v30 = vpop.eup %1308  ;;  %v1264_v31 = vpack.c.bf16 %v1527_v29, %v1523_v27 }
 0x141   : > { %v1262_v33 = vpack.c.bf16 %v1529_v30, %v1525_v28 }
 0x143   : > { %1263 = vmatprep.subr.bf16.mxu1 %v1262_v33 }
 0x144   : > { %1265 = vmatpush1.bf16.msra.mxu1 %v1264_v31  ;;  %v1156_v31 = vld [vmem:[%s1664_s5] sm:$0xff]  }
 0x145   : > { %v1157_v33 = vunpack.c.l.bf16 %v1156_v31 }
 0x147   : > { %1127 = vmatmul.mubr.msk.f32.vlgmr.msra.gmra.mrb[0].mxu1 %vm596_vm2, %v1149_v34  ;;  %v1158_v34 = vunpack.c.h.bf16 %v1156_v31 }
 0x148   : > { %679 = vmatprep.mubr.f32.mxu1 %v1335_v1 }
 0x14b   : > { %1128 = vmatmul.mubr.msk.f32.gmra.mrb[2].mxu1 %vm596_vm2, %v1150_v35  ;;  %v1169_v35 = vld [vmem:[%s1664_s5 + $0x8] sm:$0xff]  }
 0x14c   : > { %685 = vmatprep.mubr.f32.mxu1 %v1335_v1  ;;  %v1161_v36 = vunpack.c.l.bf16 %v1169_v35 }
 0x14f   : > { %1129 = vmatmul.mubr.msk.f32.gmra.mrb[4].mxu1 %vm596_vm2, %v1153_v37  ;;  %v1162_v37 = vunpack.c.h.bf16 %v1169_v35 }
 0x150   : > { %691 = vmatprep.mubr.f32.mxu1 %v1335_v1 }
 0x153   : > { %1130 = vmatmul.mubr.msk.f32.gmra.mrb[6].mxu1 %vm596_vm2, %v1154_v38  ;;  %v706_v38 = vmul.f32 %v1511_v21, %v1511_v21 }
 0x154   : > { %814 = vmatprep.mubr.f32.mxu1 %v1335_v1 }
 0x21a   : > { %v675_v40 = vpop.f32.mrb[0].mxu1 }
 0x21b   : > { %v676_v41 = vadd.f32 %v675_v40, %v579_v39  ;;  %v677_v42 = vpop.f32.mrb[1].mxu1  ;;  %v714_v40 = vsub.f32 1.0, %v706_v38 }
 0x21c   : > { %v678_v43 = vadd.f32 %v677_v42, %v579_v39  ;;  %v707_v39 = vmul.f32 %v1513_v22, %v1513_v22  ;;  %v711_v22 = vmul.f32 %v1525_v28, %v1525_v28 }
 0x21d   : > { %1310 = vtanh.f32 %v676_v41  ;;  %v708_v41 = vmul.f32 %v1515_v23, %v1515_v23 }
 0x21e   : > { %1312 = vtanh.f32 %v678_v43  ;;  %v681_v45 = vpop.f32.mrb[2].mxu1  ;;  %v715_v43 = vsub.f32 1.0, %v707_v39 }
 0x21f   : > { %v682_v46 = vadd.f32 %v681_v45, %v584_v44  ;;  %v683_v47 = vpop.f32.mrb[3].mxu1 }
 0x220   : > { %v684_v48 = vadd.f32 %v683_v47, %v584_v44  ;;  %v709_v44 = vmul.f32 %v1517_v24, %v1517_v24  ;;  %v712_v24 = vmul.f32 %v1527_v29, %v1527_v29  ;;  %v1164_v29 = vld [vmem:[%s1665_s6] sm:$0xff]  }
 0x221   : > { %1314 = vtanh.f32 %v682_v46 }
 0x222   : > { %1316 = vtanh.f32 %v684_v48  ;;  %v687_v50 = vpop.f32.mrb[4].mxu1  ;;  %v716_v48 = vsub.f32 1.0, %v708_v41  ;;  %v720_v28 = vsub.f32 1.0, %v712_v24 }
 0x223   : > { %v688_v51 = vadd.f32 %v687_v50, %v589_v49  ;;  %v689_v52 = vpop.f32.mrb[5].mxu1  ;;  %v717_v50 = vsub.f32 1.0, %v709_v44 }
 0x224   : > { %v690_v53 = vadd.f32 %v689_v52, %v589_v49  ;;  %v710_v49 = vmul.f32 %v1523_v27, %v1523_v27 }
 0x225   : > { %1318 = vtanh.f32 %v688_v51 }
 0x226   : > { %1320 = vtanh.f32 %v690_v53  ;;  %v693_v55 = vpop.f32.mrb[6].mxu1 }
 0x227   : > { %v1311_v56 = vpop.eup %1310  ;;  %v694_v57 = vadd.f32 %v693_v55, %v594_v54  ;;  %v695_v58 = vpop.f32.mrb[7].mxu1 }
 0x228   : > { %v1313_v59 = vpop.eup %1312  ;;  %v696_v60 = vadd.f32 %v695_v58, %v594_v54  ;;  %v722_v61 = vmul.f32 %v1311_v56, %v1311_v56  ;;  %v718_v54 = vsub.f32 1.0, %v710_v49  ;;  %v713_v58 = vmul.f32 %v1529_v30, %v1529_v30 }
 0x229   : > { %1322 = vtanh.f32 %v694_v57  ;;  %v723_v63 = vmul.f32 %v1313_v59, %v1313_v59  ;;  %v719_v57 = vsub.f32 1.0, %v711_v22  ;;  %v1165_v30 = vunpack.c.l.bf16 %v1164_v29 }
 0x22a   : > { %1324 = vtanh.f32 %v696_v60  ;;  %v730_v4 = vsub.f32 1.0, %v722_v61 }
 0x22b   : > { %v1315_v62 = vpop.eup %1314  ;;  %v731_v7 = vsub.f32 1.0, %v723_v63 }
 0x22c   : > { %v1317_v0 = vpop.eup %1316  ;;  %v724_v3 = vmul.f32 %v1315_v62, %v1315_v62  ;;  %v721_v62 = vsub.f32 1.0, %v713_v58 }
 0x22d   : > { %v725_v2 = vmul.f32 %v1317_v0, %v1317_v0 }
 0x22e   : > { %v732_v5 = vsub.f32 1.0, %v724_v3 }
 0x22f   : > { %v1319_v6 = vpop.eup %1318  ;;  %v733_v8 = vsub.f32 1.0, %v725_v2 }
 0x230   : > { %v1321_v9 = vpop.eup %1320  ;;  %v1268_v10 = vpack.c.bf16 %v732_v5, %v730_v4  ;;  %v726_v12 = vmul.f32 %v1319_v6, %v1319_v6  ;;  %v1166_v5 = vunpack.c.h.bf16 %v1164_v29 }
 0x231   : > { %v1266_v11 = vpack.c.bf16 %v733_v8, %v731_v7  ;;  %v727_v14 = vmul.f32 %v1321_v9, %v1321_v9 }
 0x232   : > { %v734_v18 = vsub.f32 1.0, %v726_v12 }
 0x233   : > { %v1323_v13 = vpop.eup %1322  ;;  %1267 = vmatprep.subr.bf16.mxu1 %v1266_v11  ;;  %v735_v20 = vsub.f32 1.0, %v727_v14 }
 0x234   : > { %v1325_v15 = vpop.eup %1324  ;;  %v728_v16 = vmul.f32 %v1323_v13, %v1323_v13  ;;  %1269 = vmatpush1.bf16.msra.mxu1 %v1268_v10 }
 0x235   : > { %v729_v17 = vmul.f32 %v1325_v15, %v1325_v15 }
 0x236   : > { %v736_v19 = vsub.f32 1.0, %v728_v16 }
 0x237   : > { %v737_v25 = vsub.f32 1.0, %v729_v17 }
 0x238   : > { %v1272_v26 = vpack.c.bf16 %v736_v19, %v734_v18 }
 0x239   : > { %v1270_v32 = vpack.c.bf16 %v737_v25, %v735_v20 }
 0x23b   : > { %1271 = vmatprep.subr.bf16.mxu1 %v1270_v32 }
 0x23c   : > { %1273 = vmatpush1.bf16.msra.mxu1 %v1272_v26 }
 0x23f   : > { %1131 = vmatmul.mubr.msk.f32.vlgmr.msra.gmra.mrb[8].mxu1 %vm596_vm2, %v1157_v33 }
 0x240   : > { %820 = vmatprep.mubr.f32.mxu1 %v1335_v1 }
 0x243   : > { %1132 = vmatmul.mubr.msk.f32.gmra.mrb[10].mxu1 %vm596_vm2, %v1158_v34 }
 0x244   : > { %826 = vmatprep.mubr.f32.mxu1 %v1335_v1 }
 0x247   : > { %1133 = vmatmul.mubr.msk.f32.gmra.mrb[12].mxu1 %vm596_vm2, %v1161_v36 }
 0x248   : > { %832 = vmatprep.mubr.f32.mxu1 %v1335_v1 }
 0x24b   : > { %1134 = vmatmul.mubr.msk.f32.gmra.mrb[14].mxu1 %vm596_vm2, %v1162_v37 }
 0x24c   : > { %917 = vmatprep.mubr.f32.mxu1 %v1335_v1 }
 0x312   : > { %v816_v42 = vpop.f32.mrb[8].mxu1 }
 0x313   : > { %v839_v45 = vmul.f32 %v816_v42, %v714_v40  ;;  %v818_v46 = vpop.f32.mrb[9].mxu1 }
 0x314   : > { %v840_v47 = vmul.f32 %v818_v46, %v715_v43 }
 0x316   : > { %v822_v21 = vpop.f32.mrb[10].mxu1 }
 0x317   : > { %v841_v51 = vmul.f32 %v822_v21, %v716_v48  ;;  %v824_v52 = vpop.f32.mrb[11].mxu1 }
 0x318   : > { %v842_v23 = vmul.f32 %v824_v52, %v717_v50 }
 0x319   : > { %v1276_v53 = vpack.c.bf16 %v841_v51, %v839_v45 }
 0x31a   : > { %v1274_v55 = vpack.c.bf16 %v842_v23, %v840_v47  ;;  %v828_v56 = vpop.f32.mrb[12].mxu1 }
 0x31b   : > { %v843_v27 = vmul.f32 %v828_v56, %v718_v54  ;;  %v830_v59 = vpop.f32.mrb[13].mxu1 }
 0x31c   : > { %v844_v60 = vmul.f32 %v830_v59, %v719_v57  ;;  %1275 = vmatprep.subr.bf16.mxu1 %v1274_v55 }
 0x31d   : > { %1277 = vmatpush1.bf16.msra.mxu1 %v1276_v53 }
 0x31e   : > { %v834_v61 = vpop.f32.mrb[14].mxu1 }
 0x31f   : > { %v845_v63 = vmul.f32 %v834_v61, %v720_v28  ;;  %v836_v0 = vpop.f32.mrb[15].mxu1 }
 0x320   : > { %v846_v3 = vmul.f32 %v836_v0, %v721_v62 }
 0x321   : > { %v1280_v2 = vpack.c.bf16 %v845_v63, %v843_v27 }
 0x322   : > { %v1278_v4 = vpack.c.bf16 %v846_v3, %v844_v60 }
 0x324   : > { %1279 = vmatprep.subr.bf16.mxu1 %v1278_v4 }
 0x325   : > { %1281 = vmatpush1.bf16.msra.mxu1 %v1280_v2 }
 0x328   : > { %1135 = vmatmul.mubr.msk.f32.vlgmr.msra.gmra.mrb[16].mxu1 %vm596_vm2, %v1165_v30 }
 0x329   : > { %923 = vmatprep.mubr.f32.mxu1 %v1335_v1 }
 0x32c   : > { %1136 = vmatmul.mubr.msk.f32.gmra.mrb[18].mxu1 %vm596_vm2, %v1166_v5 }
 0x3fb   : > { %v919_v6 = vpop.f32.mrb[16].mxu1 }
 0x3fc   : > { %v921_v7 = vpop.f32.mrb[17].mxu1  ;;  %930 = vxpose.xlu0.b32.start [1/2] (short) %v919_v6, 128 }
 0x3fd   : > { %962 = vxpose.xlu1.b32.start [1/2] (short) %v921_v7, 128 }
 0x3ff   : > { %v925_v8 = vpop.f32.mrb[18].mxu1 }
 0x400   : > { %v927_v9 = vpop.f32.mrb[19].mxu1  ;;  %931 = vxpose.xlu0.b32.end [2/2] (short) %v925_v8, 128 }
 0x401   : > { %963 = vxpose.xlu1.b32.end [2/2] (short) %v927_v9, 128 }
 0x47c   : > { %v946_v1 = vpop.trf.xlu0 }
 0x47d   : > { %994 = vst.msk [vmem:[%s1590_s20] sm:$0xff] %vm370_vm0, %v946_v1  ;;  %v978_v10 = vpop.trf.xlu1 }
 0x47e   : > { %1010 = vst.msk [vmem:[%s1590_s20 + $0x80] sm:$0xff] %vm370_vm0, %v978_v10 }
 0x480   : > { %v947_v11 = vpop.trf.xlu0 }
 0x481   : > { %995 = vst.msk [vmem:[%s1590_s20 + $0x8] sm:$0xff] %vm370_vm0, %v947_v11  ;;  %v979_v12 = vpop.trf.xlu1 }
 0x482   : > { %1011 = vst.msk [vmem:[%s1590_s20 + $0x88] sm:$0xff] %vm370_vm0, %v979_v12 }
 0x484   : > { %v948_v13 = vpop.trf.xlu0 }
 0x485   : > { %996 = vst.msk [vmem:[%s1590_s20 + $0x10] sm:$0xff] %vm370_vm0, %v948_v13  ;;  %v980_v14 = vpop.trf.xlu1 }
 0x486   : > { %1012 = vst.msk [vmem:[%s1590_s20 + $0x90] sm:$0xff] %vm370_vm0, %v980_v14 }
 0x488   : > { %v949_v15 = vpop.trf.xlu0 }
 0x489   : > { %997 = vst.msk [vmem:[%s1590_s20 + $0x18] sm:$0xff] %vm370_vm0, %v949_v15  ;;  %v981_v16 = vpop.trf.xlu1 }
 0x48a   : > { %1013 = vst.msk [vmem:[%s1590_s20 + $0x98] sm:$0xff] %vm370_vm0, %v981_v16 }
 0x48c   : > { %v950_v17 = vpop.trf.xlu0 }
 0x48d   : > { %998 = vst.msk [vmem:[%s1590_s20 + $0x20] sm:$0xff] %vm370_vm0, %v950_v17  ;;  %v982_v18 = vpop.trf.xlu1 }
 0x48e   : > { %1014 = vst.msk [vmem:[%s1590_s20 + $0xa0] sm:$0xff] %vm370_vm0, %v982_v18 }
 0x490   : > { %v951_v19 = vpop.trf.xlu0 }
 0x491   : > { %999 = vst.msk [vmem:[%s1590_s20 + $0x28] sm:$0xff] %vm370_vm0, %v951_v19  ;;  %v983_v20 = vpop.trf.xlu1 }
 0x492   : > { %1015 = vst.msk [vmem:[%s1590_s20 + $0xa8] sm:$0xff] %vm370_vm0, %v983_v20 }
 0x494   : > { %v952_v25 = vpop.trf.xlu0 }
 0x495   : > { %1000 = vst.msk [vmem:[%s1590_s20 + $0x30] sm:$0xff] %vm370_vm0, %v952_v25  ;;  %v984_v26 = vpop.trf.xlu1 }
 0x496   : > { %1016 = vst.msk [vmem:[%s1590_s20 + $0xb0] sm:$0xff] %vm370_vm0, %v984_v26 }
 0x498   : > { %v953_v31 = vpop.trf.xlu0 }
 0x499   : > { %1001 = vst.msk [vmem:[%s1590_s20 + $0x38] sm:$0xff] %vm370_vm0, %v953_v31  ;;  %v985_v32 = vpop.trf.xlu1 }
 0x49a   : > { %1017 = vst.msk [vmem:[%s1590_s20 + $0xb8] sm:$0xff] %vm370_vm0, %v985_v32 }
 0x49c   : > { %v954_v33 = vpop.trf.xlu0 }
 0x49d   : > { %1002 = vst.msk [vmem:[%s1590_s20 + $0x40] sm:$0xff] %vm370_vm0, %v954_v33  ;;  %v986_v34 = vpop.trf.xlu1 }
 0x49e   : > { %1018 = vst.msk [vmem:[%s1590_s20 + $0xc0] sm:$0xff] %vm370_vm0, %v986_v34 }
 0x4a0   : > { %v955_v35 = vpop.trf.xlu0 }
 0x4a1   : > { %1003 = vst.msk [vmem:[%s1590_s20 + $0x48] sm:$0xff] %vm370_vm0, %v955_v35  ;;  %v987_v36 = vpop.trf.xlu1 }
 0x4a2   : > { %1019 = vst.msk [vmem:[%s1590_s20 + $0xc8] sm:$0xff] %vm370_vm0, %v987_v36 }
 0x4a4   : > { %v956_v37 = vpop.trf.xlu0 }
 0x4a5   : > { %1004 = vst.msk [vmem:[%s1590_s20 + $0x50] sm:$0xff] %vm370_vm0, %v956_v37  ;;  %v988_v38 = vpop.trf.xlu1 }
 0x4a6   : > { %1020 = vst.msk [vmem:[%s1590_s20 + $0xd0] sm:$0xff] %vm370_vm0, %v988_v38 }
 0x4a8   : > { %v957_v39 = vpop.trf.xlu0 }
 0x4a9   : > { %1005 = vst.msk [vmem:[%s1590_s20 + $0x58] sm:$0xff] %vm370_vm0, %v957_v39  ;;  %v989_v40 = vpop.trf.xlu1 }
 0x4aa   : > { %1021 = vst.msk [vmem:[%s1590_s20 + $0xd8] sm:$0xff] %vm370_vm0, %v989_v40 }
 0x4ac   : > { %v958_v41 = vpop.trf.xlu0 }
 0x4ad   : > { %1006 = vst.msk [vmem:[%s1590_s20 + $0x60] sm:$0xff] %vm370_vm0, %v958_v41  ;;  %v990_v42 = vpop.trf.xlu1 }
 0x4ae   : > { %1022 = vst.msk [vmem:[%s1590_s20 + $0xe0] sm:$0xff] %vm370_vm0, %v990_v42 }
 0x4b0   : > { %v959_v43 = vpop.trf.xlu0 }
 0x4b1   : > { %1007 = vst.msk [vmem:[%s1590_s20 + $0x68] sm:$0xff] %vm370_vm0, %v959_v43  ;;  %v991_v44 = vpop.trf.xlu1 }
 0x4b2   : > { %1023 = vst.msk [vmem:[%s1590_s20 + $0xe8] sm:$0xff] %vm370_vm0, %v991_v44 }
 0x4b4   : > { %v960_v45 = vpop.trf.xlu0 }
 0x4b5   : > { %1008 = vst.msk [vmem:[%s1590_s20 + $0x70] sm:$0xff] %vm370_vm0, %v960_v45  ;;  %v992_v46 = vpop.trf.xlu1 }
 0x4b6   : > { %1024 = vst.msk [vmem:[%s1590_s20 + $0xf0] sm:$0xff] %vm370_vm0, %v992_v46 }
 0x4b8   : > { %v961_v47 = vpop.trf.xlu0 }
 0x4b9   : > { %1009 = vst.msk [vmem:[%s1590_s20 + $0x78] sm:$0xff] %vm370_vm0, %v961_v47  ;;  %v993_v48 = vpop.trf.xlu1 }
 0x4ba   : > { %1025 = vst.msk [vmem:[%s1590_s20 + $0xf8] sm:$0xff] %vm370_vm0, %v993_v48 }
 0x4bb PF: > { %s17_s24 = sadd.s32 1, %s1332_s24  }
 0x4bc   : > { %p14_p4 = scmp.ge.s32.totalorder %s17_s24, 4  }
 0x4be   :  { %16 = sbr.rel (!%p14_p4) target bundleno = 1 (0x1), region = 78 }

</bundles_post_ra>
